<compile_context>
chip_gen: v6e
topology: v6e:2x2x1
jax: 0.10.0
libtpu: 0.0.40
codegen_flags: <defaults>
</compile_context>

<pallas_src>
from bisect import bisect_left

import jax
import jax.numpy as jnp
from jax.experimental import pallas as pl
from jax.experimental.pallas import tpu as pltpu

_BN_EPS = 1e-5
_N_NEURONS = [128, 256, 512, 1024, 2048, 4096, 8192, 16384]


# ----------------------------------------------------------------------------
# Module-structure helpers (faithful to the PyTorch FC constructor logic).
# ----------------------------------------------------------------------------
def _pick_n_neurons(n_features):
    idx = bisect_left(_N_NEURONS, n_features)
    return _N_NEURONS[0 if idx == 0 else idx - 1]


def fc_layer_dims(in_features, out_features, n_layers, scaling_factor=4):
    """Returns the (fan_in, fan_out) of every Linear in the FC module."""
    if n_layers < 1:
        raise ValueError('"n_layers" must be positive.')
    if n_layers == 1:
        return [(in_features, out_features)]
    n_neurons = max(_pick_n_neurons(in_features), out_features)
    if n_layers == 2:
        return [(in_features, n_neurons), (n_neurons, out_features)]
    dims = []
    last = n_layers - 1
    for layer in range(n_layers):
        if layer == 0:
            n_neurons *= scaling_factor
            dims = [(in_features, n_neurons)]
        elif layer < last:
            n_in = n_neurons
            n_neurons = max(_pick_n_neurons(n_in), out_features)
            dims.append((n_in, n_neurons))
        else:
            dims.append((n_neurons, out_features))
    return dims


# ----------------------------------------------------------------------------
# Pallas kernel: one (tm, tn) output tile of  relu(A @ W + b) * scale + shift
# A and W are bf16 (MXU operands), accumulation is f32 in VMEM scratch.
# bss_ref holds [bias; bn_scale; bn_shift] stacked as a (3, tn) f32 tile.
# ----------------------------------------------------------------------------
def _fc_layer_kernel(a_ref, w_ref, bss_ref, o_ref, acc_ref):
    k = pl.program_id(2)

    @pl.when(k == 0)
    def _():
        acc_ref[...] = jnp.zeros_like(acc_ref)

    acc_ref[...] += jnp.dot(a_ref[...], w_ref[...],
                            preferred_element_type=jnp.float32)

    @pl.when(k == pl.num_programs(2) - 1)
    def _():
        bias = bss_ref[0:1, :]
        scale = bss_ref[1:2, :]
        shift = bss_ref[2:3, :]
        h = jnp.maximum(acc_ref[...] + bias, 0.0)
        o_ref[...] = (h * scale + shift).astype(o_ref.dtype)


# ----------------------------------------------------------------------------
# Tiling / budgeting helpers.
# ----------------------------------------------------------------------------
def _round_up(x, m):
    return ((x + m - 1) // m) * m


def _pad_feature(f):
    # 256-alignment fills the 256x256 MXU of v6e/v7x; 128 only for tiny dims.
    return 128 if f <= 128 else _round_up(f, 256)


def _pick_tile(padded_dim, candidates):
    for c in candidates:
        if padded_dim % c == 0:
            return c
    return padded_dim  # padded dims are multiples of 128, so 128 always hits


def _pick_tm(M):
    """Row tile minimizing padding; multiples of 16 keep bf16 sublane packing legal."""
    if M <= 128:
        return max(16, _round_up(M, 16))
    best_tm, best_mp = None, None
    for tm in (1024, 512, 256, 128):
        mp = _round_up(M, tm)
        if best_mp is None or mp < best_mp:
            best_tm, best_mp = tm, mp
    return best_tm


def _vmem_limit_bytes(tm, tn, tk, act_bytes, out_bytes):
    a = tm * tk * act_bytes          # activation tile
    w = tk * tn * 2                  # bf16 weight tile
    bss = 3 * tn * 4                 # bias/scale/shift tile
    out = tm * tn * out_bytes        # output tile
    acc = tm * tn * 4                # resident f32 accumulator
    working_set = 2 * (a + w + bss + out) + acc   # double-buffered I/O + acc
    # 2x margin for Mosaic internals; never exceed v7x's 64 MiB (cap at 48 MiB).
    return int(min(max(2 * working_set, 32 * 1024 * 1024), 48 * 1024 * 1024))


def _fused_linear_relu_bn(x_pad, w_pad, bss_pad, *, tm, out_dtype):
    """x_pad: (Mp, Kp) bf16; w_pad: (Kp, Np) bf16; bss_pad: (3, Np) f32."""
    Mp, Kp = x_pad.shape
    Kw, Np = w_pad.shape
    assert Kw == Kp, (Kw, Kp)

    tk = _pick_tile(Kp, (512, 256, 128))
    tn = _pick_tile(Np, (1024, 512, 256, 128))
    # Megacore: if the batch fits in one row tile, split N across the two TCs.
    if (Mp // tm) == 1 and (Np // tn) == 1 and Np >= 256:
        tn = Np // 2                 # Np is a multiple of 256 -> tn multiple of 128
    grid = (Mp // tm, Np // tn, Kp // tk)

    out_bytes = jnp.dtype(out_dtype).itemsize
    cost = pl.CostEstimate(
        flops=2 * Mp * Kp * Np,
        transcendentals=0,
        bytes_accessed=Mp * Kp * 2 + Kp * Np * 2 + 3 * Np * 4 + Mp * Np * out_bytes,
    )

    return pl.pallas_call(
        _fc_layer_kernel,
        out_shape=jax.ShapeDtypeStruct((Mp, Np), out_dtype),
        grid_spec=pltpu.PrefetchScalarGridSpec(
            num_scalar_prefetch=0,
            grid=grid,
            in_specs=[
                pl.BlockSpec((tm, tk), lambda i, j, k: (i, k)),   # activations (bf16)
                pl.BlockSpec((tk, tn), lambda i, j, k: (k, j)),   # weight (bf16)
                pl.BlockSpec((3, tn), lambda i, j, k: (0, j)),    # bias/scale/shift
            ],
            out_specs=pl.BlockSpec((tm, tn), lambda i, j, k: (i, j)),
            scratch_shapes=[pltpu.VMEM((tm, tn), jnp.float32)],
        ),
        compiler_params=pltpu.CompilerParams(
            dimension_semantics=("parallel", "parallel", "arbitrary"),
            vmem_limit_bytes=_vmem_limit_bytes(tm, tn, tk, 2, out_bytes),
        ),
        cost_estimate=cost,
    )(x_pad, w_pad, bss_pad)


# ----------------------------------------------------------------------------
# Parameter packing (pad to lane-dense multiples of 256/128) and forward pass.
# ----------------------------------------------------------------------------
def pack_fc_params(weights, biases, bn_params, eps=_BN_EPS):
    """weights[i]: (out, in) torch Linear layout; bn_params[i]: (gamma, beta, mean, var)."""
    packed = []
    for w, b, (gamma, beta, mean, var) in zip(weights, biases, bn_params):
        fout, fin = w.shape
        Kp, Np = _pad_feature(fin), _pad_feature(fout)
        w_pad = jnp.zeros((Kp, Np), jnp.bfloat16).at[:fin, :fout].set(
            w.T.astype(jnp.bfloat16))
        scale = gamma / jnp.sqrt(var + eps)
        shift = beta - mean * scale
        # Row 0: linear bias, row 1: bn scale (1 in padded lanes keeps them 0),
        # row 2: bn shift.
        bss = jnp.zeros((3, Np), jnp.float32)
        bss = bss.at[1, :].set(1.0)
        bss = bss.at[0, :fout].set(b)
        bss = bss.at[1, :fout].set(scale)
        bss = bss.at[2, :fout].set(shift)
        packed.append(dict(w=w_pad, bss=bss, out_features=fout))
    return packed


def fc_forward(x, layer_params):
    """x: (batch, in_features) f32. Returns (batch, out_features) f32."""
    M = x.shape[0]
    tm = _pick_tm(M)
    Mp = _round_up(M, tm)

    # Pad rows and input features once; activations stay padded + bf16 across layers.
    Kp0 = layer_params[0]["w"].shape[0]
    h = jnp.zeros((Mp, Kp0), jnp.bfloat16).at[:M, : x.shape[1]].set(
        x.astype(jnp.bfloat16))

    n = len(layer_params)
    for li, p in enumerate(layer_params):
        out_dtype = jnp.float32 if li == n - 1 else jnp.bfloat16
        h = _fused_linear_relu_bn(h, p["w"], p["bss"], tm=tm, out_dtype=out_dtype)

    return h[:M, : layer_params[-1]["out_features"]]


# ----------------------------------------------------------------------------
if __name__ == "__main__":
    # FC(in_features=32, out_features=8, n_layers=2) -> Linear(32,128)+ReLU+BN,
    # Linear(128,8)+ReLU+BN  (hidden width 128 comes from _pick_n_neurons).
    batch, in_features, out_features, n_layers = 16, 32, 8, 2
    dims = fc_layer_dims(in_features, out_features, n_layers)

    key = jax.random.PRNGKey(0)
    key, kx = jax.random.split(key)
    x = jax.random.normal(kx, (batch, in_features), dtype=jnp.float32)

    weights, biases, bn = [], [], []
    for fin, fout in dims:
        key, kw, kb, kg, kbe, km, kv = jax.random.split(key, 7)
        weights.append(jax.random.normal(kw, (fout, fin), jnp.float32) / jnp.sqrt(fin))
        biases.append(0.01 * jax.random.normal(kb, (fout,), jnp.float32))
        gamma = 1.0 + 0.1 * jax.random.normal(kg, (fout,), jnp.float32)
        beta = 0.1 * jax.random.normal(kbe, (fout,), jnp.float32)
        mean = 0.1 * jax.random.normal(km, (fout,), jnp.float32)
        var = jax.random.uniform(kv, (fout,), jnp.float32, minval=0.5, maxval=1.5)
        bn.append((gamma, beta, mean, var))

    params = pack_fc_params(weights, biases, bn)

    fwd = jax.jit(lambda xx: fc_forward(xx, params))
    y = jax.block_until_ready(fwd(x))
    assert y.shape == (batch, out_features)
    assert y.dtype == jnp.float32

    # Reference: same math (bf16 matmul operands, f32 accumulate, eval-mode BN,
    # bf16 inter-layer activations just like the kernel).
    h = x.astype(jnp.bfloat16)
    for i, (w, b, (gamma, beta, mean, var)) in enumerate(zip(weights, biases, bn)):
        a = jnp.dot(h, w.T.astype(jnp.bfloat16),
                    preferred_element_type=jnp.float32) + b
        a = jnp.maximum(a, 0.0)
        a = (a - mean) / jnp.sqrt(var + _BN_EPS) * gamma + beta
        h = a.astype(jnp.float32) if i == len(weights) - 1 else a.astype(jnp.bfloat16)
    ref = h

    assert jnp.allclose(y, ref, atol=3e-2, rtol=3e-2), float(jnp.max(jnp.abs(y - ref)))
    print("KERNEL_OK")
</pallas_src>

<mosaic_0001>
module attributes {stable_mosaic.version = 11 : i64} {
  func.func @_fc_layer_kernel(%arg0: i32, %arg1: i32, %arg2: i32, %arg3: memref<16x128xbf16, #tpu.memory_space<vmem>>, %arg4: memref<128x128xbf16, #tpu.memory_space<vmem>>, %arg5: memref<3x128xf32, #tpu.memory_space<vmem>>, %arg6: memref<16x128xbf16, #tpu.memory_space<vmem>>, %arg7: memref<16x128xf32, #tpu.memory_space<vmem>>) attributes {dimension_semantics = [#tpu.dimension_semantics<parallel>, #tpu.dimension_semantics<parallel>, #tpu.dimension_semantics<arbitrary>], iteration_bounds = array<i64: 1, 1, 1>, scalar_prefetch = 0 : i64, scratch_operands = 1 : i64, tpu.core_type = #tpu.core_type<tc>, window_params = [{transform_indices = @transform_0, window_bounds = array<i64: 16, 128>}, {transform_indices = @transform_1, window_bounds = array<i64: 128, 128>}, {transform_indices = @transform_2, window_bounds = array<i64: 3, 128>}, {transform_indices = @transform_3, window_bounds = array<i64: 16, 128>}]} {
    %c0_i32 = arith.constant 0 : i32
    %0 = arith.cmpi eq, %arg2, %c0_i32 : i32
    %1 = arith.extui %0 : i1 to i32
    %c0_i32_0 = arith.constant 0 : i32
    %2 = arith.cmpi ne, %1, %c0_i32_0 : i32
    scf.if %2 {
      %cst_10 = arith.constant 0.000000e+00 : f32
      %12 = vector.broadcast %cst_10 : f32 to vector<16x128xf32>
      %c0_11 = arith.constant 0 : index
      %c0_12 = arith.constant 0 : index
      %13 = vector.load %arg7[%c0_11, %c0_12] : memref<16x128xf32, #tpu.memory_space<vmem>>, vector<16x128xf32>
      tpu.vector_store %arg7[%c0_11, %c0_12], %12 {strides = array<i32>} : memref<16x128xf32, #tpu.memory_space<vmem>>, vector<16x128xf32>,
    } else {
    }
    %c0 = arith.constant 0 : index
    %c0_1 = arith.constant 0 : index
    %3 = vector.load %arg7[%c0, %c0_1] : memref<16x128xf32, #tpu.memory_space<vmem>>, vector<16x128xf32>
    %c0_2 = arith.constant 0 : index
    %c0_3 = arith.constant 0 : index
    %4 = vector.load %arg3[%c0_2, %c0_3] : memref<16x128xbf16, #tpu.memory_space<vmem>>, vector<16x128xbf16>
    %c0_4 = arith.constant 0 : index
    %c0_5 = arith.constant 0 : index
    %5 = vector.load %arg4[%c0_4, %c0_5] : memref<128x128xbf16, #tpu.memory_space<vmem>>, vector<128x128xbf16>
    %cst = arith.constant dense<0.000000e+00> : vector<16x128xf32>
    %6 = tpu.matmul %4, %5, %cst {dimension_numbers = #tpu.dot_dimension_numbers<[1], [0], [0], [1], [0, 0, 1, 1], [], []>} : vector<16x128xbf16>, vector<128x128xbf16>, vector<16x128xf32> -> vector<16x128xf32>
    %7 = arith.addf %3, %6 : vector<16x128xf32>
    %c0_6 = arith.constant 0 : index
    %c0_7 = arith.constant 0 : index
    %8 = vector.load %arg7[%c0_6, %c0_7] : memref<16x128xf32, #tpu.memory_space<vmem>>, vector<16x128xf32>
    tpu.vector_store %arg7[%c0_6, %c0_7], %7 {strides = array<i32>} : memref<16x128xf32, #tpu.memory_space<vmem>>, vector<16x128xf32>,
    %c0_i32_8 = arith.constant 0 : i32
    %9 = arith.cmpi eq, %arg2, %c0_i32_8 : i32
    %10 = arith.extui %9 : i1 to i32
    %c0_i32_9 = arith.constant 0 : i32
    %11 = arith.cmpi ne, %10, %c0_i32_9 : i32
    scf.if %11 {
      %c0_10 = arith.constant 0 : index
      %c0_11 = arith.constant 0 : index
      %12 = vector.load %arg5[%c0_10, %c0_11] : memref<3x128xf32, #tpu.memory_space<vmem>>, vector<1x128xf32>
      %c1 = arith.constant 1 : index
      %c0_12 = arith.constant 0 : index
      %13 = vector.load %arg5[%c1, %c0_12] : memref<3x128xf32, #tpu.memory_space<vmem>>, vector<1x128xf32>
      %c2 = arith.constant 2 : index
      %c0_13 = arith.constant 0 : index
      %14 = vector.load %arg5[%c2, %c0_13] : memref<3x128xf32, #tpu.memory_space<vmem>>, vector<1x128xf32>
      %c0_14 = arith.constant 0 : index
      %c0_15 = arith.constant 0 : index
      %15 = vector.load %arg7[%c0_14, %c0_15] : memref<16x128xf32, #tpu.memory_space<vmem>>, vector<16x128xf32>
      %16 = vector.broadcast %12 : vector<1x128xf32> to vector<16x128xf32>
      %17 = arith.addf %15, %16 : vector<16x128xf32>
      %cst_16 = arith.constant 0.000000e+00 : f32
      %18 = vector.broadcast %cst_16 : f32 to vector<16x128xf32>
      %19 = arith.maximumf %17, %18 : vector<16x128xf32>
      %20 = vector.broadcast %13 : vector<1x128xf32> to vector<16x128xf32>
      %21 = arith.mulf %19, %20 : vector<16x128xf32>
      %22 = vector.broadcast %14 : vector<1x128xf32> to vector<16x128xf32>
      %23 = arith.addf %21, %22 : vector<16x128xf32>
      %24 = arith.truncf %23 : vector<16x128xf32> to vector<16x128xbf16>
      %c0_17 = arith.constant 0 : index
      %c0_18 = arith.constant 0 : index
      %25 = vector.load %arg6[%c0_17, %c0_18] : memref<16x128xbf16, #tpu.memory_space<vmem>>, vector<16x128xbf16>
      tpu.vector_store %arg6[%c0_17, %c0_18], %24 {strides = array<i32>} : memref<16x128xbf16, #tpu.memory_space<vmem>>, vector<16x128xbf16>,
    } else {
    }
    return
  }
  func.func @transform_0(%arg0: i32, %arg1: i32, %arg2: i32) -> (i32, i32) {
    %c0_i32 = arith.constant 0 : i32
    return %arg0, %arg2 : i32, i32
  }
  func.func @transform_1(%arg0: i32, %arg1: i32, %arg2: i32) -> (i32, i32) {
    %c0_i32 = arith.constant 0 : i32
    return %arg2, %arg1 : i32, i32
  }
  func.func @transform_2(%arg0: i32, %arg1: i32, %arg2: i32) -> (i32, i32) {
    %c0_i32 = arith.constant 0 : i32
    %c0_i32_0 = arith.constant 0 : i32
    return %c0_i32, %arg1 : i32, i32
  }
  func.func @transform_3(%arg0: i32, %arg1: i32, %arg2: i32) -> (i32, i32) {
    %c0_i32 = arith.constant 0 : i32
    return %arg0, %arg1 : i32, i32
  }
}

module attributes {stable_mosaic.version = 11 : i64} {
  func.func @_fc_layer_kernel(%arg0: i32, %arg1: i32, %arg2: i32, %arg3: memref<16x128xbf16, #tpu.memory_space<vmem>>, %arg4: memref<128x128xbf16, #tpu.memory_space<vmem>>, %arg5: memref<3x128xf32, #tpu.memory_space<vmem>>, %arg6: memref<16x128xf32, #tpu.memory_space<vmem>>, %arg7: memref<16x128xf32, #tpu.memory_space<vmem>>) attributes {dimension_semantics = [#tpu.dimension_semantics<parallel>, #tpu.dimension_semantics<parallel>, #tpu.dimension_semantics<arbitrary>], iteration_bounds = array<i64: 1, 1, 1>, scalar_prefetch = 0 : i64, scratch_operands = 1 : i64, tpu.core_type = #tpu.core_type<tc>, window_params = [{transform_indices = @transform_0, window_bounds = array<i64: 16, 128>}, {transform_indices = @transform_1, window_bounds = array<i64: 128, 128>}, {transform_indices = @transform_2, window_bounds = array<i64: 3, 128>}, {transform_indices = @transform_3, window_bounds = array<i64: 16, 128>}]} {
    %c0_i32 = arith.constant 0 : i32
    %0 = arith.cmpi eq, %arg2, %c0_i32 : i32
    %1 = arith.extui %0 : i1 to i32
    %c0_i32_0 = arith.constant 0 : i32
    %2 = arith.cmpi ne, %1, %c0_i32_0 : i32
    scf.if %2 {
      %cst_10 = arith.constant 0.000000e+00 : f32
      %12 = vector.broadcast %cst_10 : f32 to vector<16x128xf32>
      %c0_11 = arith.constant 0 : index
      %c0_12 = arith.constant 0 : index
      %13 = vector.load %arg7[%c0_11, %c0_12] : memref<16x128xf32, #tpu.memory_space<vmem>>, vector<16x128xf32>
      tpu.vector_store %arg7[%c0_11, %c0_12], %12 {strides = array<i32>} : memref<16x128xf32, #tpu.memory_space<vmem>>, vector<16x128xf32>,
    } else {
    }
    %c0 = arith.constant 0 : index
    %c0_1 = arith.constant 0 : index
    %3 = vector.load %arg7[%c0, %c0_1] : memref<16x128xf32, #tpu.memory_space<vmem>>, vector<16x128xf32>
    %c0_2 = arith.constant 0 : index
    %c0_3 = arith.constant 0 : index
    %4 = vector.load %arg3[%c0_2, %c0_3] : memref<16x128xbf16, #tpu.memory_space<vmem>>, vector<16x128xbf16>
    %c0_4 = arith.constant 0 : index
    %c0_5 = arith.constant 0 : index
    %5 = vector.load %arg4[%c0_4, %c0_5] : memref<128x128xbf16, #tpu.memory_space<vmem>>, vector<128x128xbf16>
    %cst = arith.constant dense<0.000000e+00> : vector<16x128xf32>
    %6 = tpu.matmul %4, %5, %cst {dimension_numbers = #tpu.dot_dimension_numbers<[1], [0], [0], [1], [0, 0, 1, 1], [], []>} : vector<16x128xbf16>, vector<128x128xbf16>, vector<16x128xf32> -> vector<16x128xf32>
    %7 = arith.addf %3, %6 : vector<16x128xf32>
    %c0_6 = arith.constant 0 : index
    %c0_7 = arith.constant 0 : index
    %8 = vector.load %arg7[%c0_6, %c0_7] : memref<16x128xf32, #tpu.memory_space<vmem>>, vector<16x128xf32>
    tpu.vector_store %arg7[%c0_6, %c0_7], %7 {strides = array<i32>} : memref<16x128xf32, #tpu.memory_space<vmem>>, vector<16x128xf32>,
    %c0_i32_8 = arith.constant 0 : i32
    %9 = arith.cmpi eq, %arg2, %c0_i32_8 : i32
    %10 = arith.extui %9 : i1 to i32
    %c0_i32_9 = arith.constant 0 : i32
    %11 = arith.cmpi ne, %10, %c0_i32_9 : i32
    scf.if %11 {
      %c0_10 = arith.constant 0 : index
      %c0_11 = arith.constant 0 : index
      %12 = vector.load %arg5[%c0_10, %c0_11] : memref<3x128xf32, #tpu.memory_space<vmem>>, vector<1x128xf32>
      %c1 = arith.constant 1 : index
      %c0_12 = arith.constant 0 : index
      %13 = vector.load %arg5[%c1, %c0_12] : memref<3x128xf32, #tpu.memory_space<vmem>>, vector<1x128xf32>
      %c2 = arith.constant 2 : index
      %c0_13 = arith.constant 0 : index
      %14 = vector.load %arg5[%c2, %c0_13] : memref<3x128xf32, #tpu.memory_space<vmem>>, vector<1x128xf32>
      %c0_14 = arith.constant 0 : index
      %c0_15 = arith.constant 0 : index
      %15 = vector.load %arg7[%c0_14, %c0_15] : memref<16x128xf32, #tpu.memory_space<vmem>>, vector<16x128xf32>
      %16 = vector.broadcast %12 : vector<1x128xf32> to vector<16x128xf32>
      %17 = arith.addf %15, %16 : vector<16x128xf32>
      %cst_16 = arith.constant 0.000000e+00 : f32
      %18 = vector.broadcast %cst_16 : f32 to vector<16x128xf32>
      %19 = arith.maximumf %17, %18 : vector<16x128xf32>
      %20 = vector.broadcast %13 : vector<1x128xf32> to vector<16x128xf32>
      %21 = arith.mulf %19, %20 : vector<16x128xf32>
      %22 = vector.broadcast %14 : vector<1x128xf32> to vector<16x128xf32>
      %23 = arith.addf %21, %22 : vector<16x128xf32>
      %c0_17 = arith.constant 0 : index
      %c0_18 = arith.constant 0 : index
      %24 = vector.load %arg6[%c0_17, %c0_18] : memref<16x128xf32, #tpu.memory_space<vmem>>, vector<16x128xf32>
      tpu.vector_store %arg6[%c0_17, %c0_18], %23 {strides = array<i32>} : memref<16x128xf32, #tpu.memory_space<vmem>>, vector<16x128xf32>,
    } else {
    }
    return
  }
  func.func @transform_0(%arg0: i32, %arg1: i32, %arg2: i32) -> (i32, i32) {
    %c0_i32 = arith.constant 0 : i32
    return %arg0, %arg2 : i32, i32
  }
  func.func @transform_1(%arg0: i32, %arg1: i32, %arg2: i32) -> (i32, i32) {
    %c0_i32 = arith.constant 0 : i32
    return %arg2, %arg1 : i32, i32
  }
  func.func @transform_2(%arg0: i32, %arg1: i32, %arg2: i32) -> (i32, i32) {
    %c0_i32 = arith.constant 0 : i32
    %c0_i32_0 = arith.constant 0 : i32
    return %c0_i32, %arg1 : i32, i32
  }
  func.func @transform_3(%arg0: i32, %arg1: i32, %arg2: i32) -> (i32, i32) {
    %c0_i32 = arith.constant 0 : i32
    return %arg0, %arg1 : i32, i32
  }
}

</mosaic_0001>

<bundles_post_ra>
// kernel: _lambda_.2
= control target key start
LH: loop header
LB: loop body
LE: loop exit
PB: predicated region body
PF: predicated region fallthrough
CT: control target
= control target key end

     0   :  { %8 = vsyncpa [#allocation4], 0  ;;  %s283_s12 = smov [#allocation3]   ;;  %s326_s0 = inlined_call_operand.vmem [shape: bf16[16,128], index: 0, kind: input, shape index: {}]   ;;  %s327_s1 = inlined_call_operand.hbm [shape: bf16[128,128], index: 1, kind: input, shape index: {}]   ;;  %s328_s2 = inlined_call_operand.vmem [shape: f32[3,128], index: 2, kind: input, shape index: {}]   ;;  %s329_s3 = inlined_call_operand.vmem [shape: bf16[16,128], index: 3, kind: output, shape index: {}]  }
   0x1   :  { %s16_s13 = sshll.u32 %s283_s12, 4  ;;  %s17_s13 = int_to_ptr.vmem [resolvable:$true] %s16_s13 }
   0x2   :  { %s269_s14 = scalar_lea.vmem %s17_s13, 1024  ;;  %p274_p1 = scmp.lt.s32.totalorder %s17_s13, %s17_s13 }
   0x3   :  { %p270_p0 = scmp.ne.s32.totalorder %s17_s13, %s269_s14  ;;  %p275_p2 = scmp.lt.s32.totalorder %s269_s14, %s269_s14 }
   0x5   :  { %p276_p3 = por %p275_p2, %p274_p1 }
   0x7   :  { %p277_p4 = pnand %p276_p3, %p270_p0 }
   0x9   :  { %280 = shalt.err (!%p277_p4)
}
   0xa   :  { %s284_s15 = smov 64   ;;  %s285_s16 = smov 4  }
   0xb   :  { %22 = dma.hbm_to_vmem [thread:$0]  %s327_s1, 1024, %s17_s13, [#allocation4], %s284_s15, %s284_s15, %s285_s16  }
   0xc   :  { %281 = dma.done.wait [#allocation4], 1024  }
   0xd   :  { %282 = vsyncadd [#allocation4], 4294966272  ;;  %v286_v0 = vmov 0.0   ;;  %vm287_vm0 = vmmov 0   ;;  %v252_v1 = vld [vmem:[#allocation3 + $0x38] sm:$0xff]   ;;  %v253_v2 = vld [vmem:[#allocation3 + $0x30] sm:$0xff]  }
   0xe   :  { %227 = vmatprep.subr.bf16.mxu0 %v286_v0  ;;  %243 = vmatprep.mubr.msk.bf16.mxu0 %vm287_vm0, %v286_v0  ;;  %v254_v3 = vld [vmem:[#allocation3 + $0x28] sm:$0xff]   ;;  %v255_v4 = vld [vmem:[#allocation3 + $0x20] sm:$0xff]   ;;  %v256_v5 = vld [vmem:[#allocation3 + $0x18] sm:$0xff]  }
   0xf   :  { %228 = vmatpush3.bf16.msra.mxu0 %v252_v1  ;;  %v257_v6 = vld [vmem:[#allocation3 + $0x10] sm:$0xff]   ;;  %v258_v7 = vld [vmem:[#allocation3 + $0x8] sm:$0xff]   ;;  %v259_v8 = vld [vmem:[#allocation3] sm:$0xff]  }
  0x10   :  { %229 = vmatprep.subr.bf16.mxu0 %v286_v0  ;;  %v260_v9 = vld [vmem:[%s326_s0] sm:$0xff]  }
  0x11   :  { %v206_v10 = vld [vmem:[%s328_s2] ss:$0 sm:$0xff]  ;;  %v207_v15 = vld [vmem:[%s328_s2 + $0x1] ss:$0 sm:$0xff]  ;;  %v208_v21 = vld [vmem:[%s328_s2 + $0x2] ss:$0 sm:$0xff] }
  0x13   :  { %230 = vmatpush3.bf16.msra.mxu0 %v253_v2 }
  0x14   :  { %231 = vmatprep.subr.bf16.mxu0 %v286_v0 }
  0x17   :  { %232 = vmatpush3.bf16.msra.mxu0 %v254_v3 }
  0x18   :  { %233 = vmatprep.subr.bf16.mxu0 %v286_v0 }
  0x1b   :  { %234 = vmatpush3.bf16.msra.mxu0 %v255_v4 }
  0x1c   :  { %235 = vmatprep.subr.bf16.mxu0 %v286_v0 }
  0x1f   :  { %236 = vmatpush3.bf16.msra.mxu0 %v256_v5 }
  0x20   :  { %237 = vmatprep.subr.bf16.mxu0 %v286_v0 }
  0x23   :  { %238 = vmatpush3.bf16.msra.mxu0 %v257_v6 }
  0x24   :  { %239 = vmatprep.subr.bf16.mxu0 %v286_v0 }
  0x27   :  { %240 = vmatpush3.bf16.msra.mxu0 %v258_v7 }
  0x28   :  { %241 = vmatprep.subr.bf16.mxu0 %v286_v0 }
  0x2b   :  { %242 = vmatpush3.bf16.msra.mxu0 %v259_v8 }
  0x2e   :  { %244 = vmatmul.mubr.bf16.vlgmr.msra.gmra.mxu0 %v260_v9 }
  0xee   :  { %v143_v11 = vpop.f32.mrf.mxu0 }
  0xef   :  { %v166_v12 = vadd.f32 %v206_v10, %v143_v11 }
  0xf0   :  { %v245_v13 = vpop.f32.mrf.mxu0 }
  0xf1   :  { %v168_v14 = vmax.f32 %v166_v12, 0.0 }
  0xf2   :  { %v146_v16 = vpop.f32.mrf.mxu0 }
  0xf3   :  { %v167_v17 = vadd.f32 %v206_v10, %v146_v16  ;;  %v174_v19 = vmul.f32 %v207_v15, %v168_v14 }
  0xf4   :  { %v246_v18 = vpop.f32.mrf.mxu0 }
  0xf5   :  { %v169_v20 = vmax.f32 %v167_v17, 0.0  ;;  %v180_v23 = vadd.f32 %v208_v21, %v174_v19 }
  0xf7   :  { %v175_v22 = vmul.f32 %v207_v15, %v169_v20 }
  0xf9   :  { %v181_v24 = vadd.f32 %v208_v21, %v175_v22 }
  0xfb   :  { %v216_v25 = vpack.c.bf16 %v181_v24, %v180_v23 }
  0xfd   :  { %217 = vst [vmem:[%s329_s3] sm:$0xff] %v216_v25  }
  0xfe   :  { %196 = vsyncpa [#allocation4], 1 }

// kernel: _lambda_.3
= control target key start
LH: loop header
LB: loop body
LE: loop exit
PB: predicated region body
PF: predicated region fallthrough
CT: control target
= control target key end

     0   :  { %v226_v0 = vmov 0.0   ;;  %vm227_vm0 = vmmov 0   ;;  %s290_s1 = inlined_call_operand.vmem [shape: bf16[128,128], index: 1, kind: input, shape index: {}]   ;;  %s291_s0 = inlined_call_operand.vmem [shape: bf16[16,128], index: 0, kind: input, shape index: {}]   ;;  %s292_s2 = inlined_call_operand.vmem [shape: f32[3,128], index: 2, kind: input, shape index: {}]   ;;  %s293_s3 = inlined_call_operand.vmem [shape: f32[16,128], index: 3, kind: output, shape index: {}]  }
   0x1   :  { %195 = vmatprep.subr.bf16.mxu0 %v226_v0  ;;  %v217_v1 = vld [vmem:[%s290_s1 + $0x38] sm:$0xff]   ;;  %211 = vmatprep.mubr.msk.bf16.mxu0 %vm227_vm0, %v226_v0  ;;  %v218_v2 = vld [vmem:[%s290_s1 + $0x30] sm:$0xff]   ;;  %v219_v3 = vld [vmem:[%s290_s1 + $0x28] sm:$0xff]  }
   0x2   :  { %196 = vmatpush3.bf16.msra.mxu0 %v217_v1  ;;  %v220_v4 = vld [vmem:[%s290_s1 + $0x20] sm:$0xff]   ;;  %v221_v5 = vld [vmem:[%s290_s1 + $0x18] sm:$0xff]   ;;  %v222_v6 = vld [vmem:[%s290_s1 + $0x10] sm:$0xff]  }
   0x3   :  { %197 = vmatprep.subr.bf16.mxu0 %v226_v0  ;;  %v223_v7 = vld [vmem:[%s290_s1 + $0x8] sm:$0xff]   ;;  %v224_v8 = vld [vmem:[%s290_s1] sm:$0xff]  }
   0x4   :  { %v225_v9 = vld [vmem:[%s291_s0] sm:$0xff]  }
   0x5   :  { %v183_v10 = vld [vmem:[%s292_s2] ss:$0 sm:$0xff]  ;;  %v184_v13 = vld [vmem:[%s292_s2 + $0x1] ss:$0 sm:$0xff]  ;;  %v185_v16 = vld [vmem:[%s292_s2 + $0x2] ss:$0 sm:$0xff] }
   0x6   :  { %198 = vmatpush3.bf16.msra.mxu0 %v218_v2 }
   0x7   :  { %199 = vmatprep.subr.bf16.mxu0 %v226_v0 }
   0xa   :  { %200 = vmatpush3.bf16.msra.mxu0 %v219_v3 }
   0xb   :  { %201 = vmatprep.subr.bf16.mxu0 %v226_v0 }
   0xe   :  { %202 = vmatpush3.bf16.msra.mxu0 %v220_v4 }
   0xf   :  { %203 = vmatprep.subr.bf16.mxu0 %v226_v0 }
  0x12   :  { %204 = vmatpush3.bf16.msra.mxu0 %v221_v5 }
  0x13   :  { %205 = vmatprep.subr.bf16.mxu0 %v226_v0 }
  0x16   :  { %206 = vmatpush3.bf16.msra.mxu0 %v222_v6 }
  0x17   :  { %207 = vmatprep.subr.bf16.mxu0 %v226_v0 }
  0x1a   :  { %208 = vmatpush3.bf16.msra.mxu0 %v223_v7 }
  0x1b   :  { %209 = vmatprep.subr.bf16.mxu0 %v226_v0 }
  0x1e   :  { %210 = vmatpush3.bf16.msra.mxu0 %v224_v8 }
  0x21   :  { %212 = vmatmul.mubr.bf16.vlgmr.msra.gmra.mxu0 %v225_v9 }
  0xe1   :  { %v129_v11 = vpop.f32.mrf.mxu0 }
  0xe2   :  { %v152_v12 = vadd.f32 %v183_v10, %v129_v11 }
  0xe3   :  { %v213_v14 = vpop.f32.mrf.mxu0 }
  0xe4   :  { %v154_v15 = vmax.f32 %v152_v12, 0.0 }
  0xe5   :  { %v132_v17 = vpop.f32.mrf.mxu0 }
  0xe6   :  { %v160_v18 = vmul.f32 %v184_v13, %v154_v15  ;;  %v153_v19 = vadd.f32 %v183_v10, %v132_v17 }
  0xe7   :  { %v214_v20 = vpop.f32.mrf.mxu0 }
  0xe8   :  { %v166_v21 = vadd.f32 %v185_v16, %v160_v18  ;;  %v155_v22 = vmax.f32 %v153_v19, 0.0 }
  0xea   :  { %168 = vst [vmem:[%s293_s3] sm:$0xff] %v166_v21  ;;  %v161_v23 = vmul.f32 %v184_v13, %v155_v22 }
  0xec   :  { %v167_v24 = vadd.f32 %v185_v16, %v161_v23 }
  0xee   :  { %169 = vst [vmem:[%s293_s3 + $0x8] sm:$0xff] %v167_v24 }

</bundles_post_ra>
